<compile_context>
chip_gen: v7x
topology: tpu7x:2x2x1
jax: 0.10.0
libtpu: 0.0.40
codegen_flags: <defaults>
</compile_context>

<pallas_src>
import jax
import jax.numpy as jnp
from jax import lax
from jax.experimental import pallas as pl
from jax.experimental.pallas import tpu as pltpu


def _round_up(x, m):
    return ((x + m - 1) // m) * m


_TM_CANDS = (512, 256, 128, 64, 32, 16, 8)      # row tile (sublane axis, mult of 8)
_TK_CANDS = (2048, 1024, 512, 256, 128)         # contraction tile (lane axis, mult of 128)


def _choose_tiles(n):
    """Pick (tm, tk, n_pad): row tile, contraction tile, padded node count."""
    def pick(cands, m, want_multi):
        for c in cands:
            if m % c == 0 and (not want_multi or m // c >= 2):
                return c
        return None

    # Prefer tiles that divide N exactly -> A is passed straight through, no pad copy.
    tm = pick(_TM_CANDS, n, True) or pick(_TM_CANDS, n, False)
    tk = pick(_TK_CANDS, n, False)
    if tm is not None and tk is not None:
        return tm, tk, n

    # Ragged N: pad once to a multiple of 128 (fallback only).
    n_pad = _round_up(n, 128)
    tm = pick(_TM_CANDS, n_pad, True) or 128
    tk = pick(_TK_CANDS, n_pad, False) or 128
    return tm, tk, n_pad


# ---------------------------------------------------------------------------
# Kernel bodies: one (tm, f_pad) block of Y = A @ Hs, contraction axis last.
# program_id / num_programs are read at the top level only (never inside pl.when).
# ---------------------------------------------------------------------------

def _agg_kernel_resident(hs_ref, a_ref, o_ref, acc_ref):
    """Hs fully VMEM-resident; A streamed in (tm, tk) bf16 blocks."""
    k = pl.program_id(1)
    last = pl.num_programs(1) - 1
    tk = a_ref.shape[1]

    @pl.when(k == 0)
    def _init():
        acc_ref[...] = jnp.zeros_like(acc_ref)

    a_blk = a_ref[...].astype(jnp.float32)          # exact 0/1 widen (VPU, hidden under DMA)
    acc_ref[...] += jnp.dot(a_blk, hs_ref[pl.ds(k * tk, tk), :],
                            preferred_element_type=jnp.float32)

    @pl.when(k == last)
    def _finalize():
        o_ref[...] = acc_ref[...]


def _agg_kernel_ktiled(hs_ref, a_ref, o_ref, acc_ref):
    """Hs streamed in (tk, f_pad) blocks (large-N path, avoids the VMEM cliff)."""
    k = pl.program_id(1)
    last = pl.num_programs(1) - 1

    @pl.when(k == 0)
    def _init():
        acc_ref[...] = jnp.zeros_like(acc_ref)

    acc_ref[...] += jnp.dot(a_ref[...].astype(jnp.float32), hs_ref[...],
                            preferred_element_type=jnp.float32)

    @pl.when(k == last)
    def _finalize():
        o_ref[...] = acc_ref[...]


# ---------------------------------------------------------------------------
# Wrapper
# ---------------------------------------------------------------------------

def gcn_layer(A, X, W, b):
    """GCNLayer.forward(A, X) with torch nn.Linear params W:[f_out, f_in], b:[f_out]."""
    N = A.shape[0]
    f_out = W.shape[0]
    f_pad = _round_up(f_out, 128)                    # lane-dense feature axis

    tm, tk, n_pad = _choose_tiles(N)

    # --- narrow, exact 0/1 adjacency stream (halves the dominant N^2 term) ---
    a_s = A.astype(jnp.bfloat16)
    if n_pad != N:                                   # fallback only for ragged N
        a_s = jnp.zeros((n_pad, n_pad), jnp.bfloat16).at[:N, :N].set(a_s)

    # --- O(N) degree pass + O(N*F) projection left to XLA --------------------
    deg = jnp.sum(a_s, axis=0, dtype=jnp.float32)    # exact integer degrees
    d = (deg + 1.0) ** -0.5                          # colsum(A_hat) ** -0.5
    h = jnp.dot(X, W.T, precision=lax.Precision.HIGHEST) + b
    hs = jnp.zeros((n_pad, f_pad), jnp.float32).at[:N, :f_out].set(d[:N, None] * h)

    nt_i = n_pad // tm
    nt_k = n_pad // tk

    # --- Hs residency guard (avoid VMEM cliff on v7x / v5e) ------------------
    hs_bytes = n_pad * f_pad * 4
    resident = hs_bytes <= 12 * 1024 * 1024
    if resident:
        kernel = _agg_kernel_resident
        hs_spec = pl.BlockSpec((n_pad, f_pad), lambda i, k: (0, 0))   # read once
        hs_traffic = hs_bytes
    else:
        kernel = _agg_kernel_ktiled
        hs_spec = pl.BlockSpec((tk, f_pad), lambda i, k: (k, 0))      # re-read per i
        hs_traffic = nt_i * hs_bytes

    y = pl.pallas_call(
        kernel,
        out_shape=jax.ShapeDtypeStruct((n_pad, f_pad), jnp.float32),
        grid=(nt_i, nt_k),                                            # contraction axis last
        in_specs=[
            hs_spec,
            pl.BlockSpec((tm, tk), lambda i, k: (i, k)),              # A streamed (bf16)
        ],
        out_specs=pl.BlockSpec((tm, f_pad), lambda i, k: (i, 0)),
        scratch_shapes=[pltpu.VMEM((tm, f_pad), jnp.float32)],        # f32 accumulator
        compiler_params=pltpu.CompilerParams(
            dimension_semantics=("parallel", "arbitrary"),
            vmem_limit_bytes=48 * 1024 * 1024),
        cost_estimate=pl.CostEstimate(
            flops=2 * n_pad * n_pad * f_pad,
            transcendentals=0,
            bytes_accessed=2 * n_pad * n_pad + hs_traffic + 4 * n_pad * f_pad),
    )(hs, a_s)

    # Residual + left normalisation + slice: O(N*f_out) elementwise, fused by XLA.
    return d[:N, None] * (y[:N, :f_out] + hs[:N, :f_out])


if __name__ == "__main__":
    # Small synthetic graph (Cora stand-in): N nodes, in_size features, out_size classes.
    N, in_size, out_size = 128, 32, 8

    key = jax.random.PRNGKey(0)
    k_a, k_x, k_w, k_b = jax.random.split(key, 4)

    # Dense 0/1 adjacency (A + I guarantees degree >= 1, so the rsqrt is safe).
    A = jax.random.bernoulli(k_a, p=0.05, shape=(N, N)).astype(jnp.float32)
    X = jax.random.normal(k_x, (N, in_size), dtype=jnp.float32)

    # Deterministic nn.Linear(in_size, out_size)-shaped params.
    bound = 1.0 / (in_size ** 0.5)
    W = jax.random.uniform(k_w, (out_size, in_size), jnp.float32, -bound, bound)
    b = jax.random.uniform(k_b, (out_size,), jnp.float32, -bound, bound)

    out = jax.block_until_ready(gcn_layer(A, X, W, b))

    # Pure-JAX reference of the exact PyTorch semantics (high-precision matmuls).
    A_hat = A + jnp.eye(N, dtype=jnp.float32)
    d_inv = A_hat.sum(0) ** -0.5
    H = jnp.dot(X, W.T, precision=lax.Precision.HIGHEST) + b
    ref = jnp.dot(d_inv[:, None] * A_hat * d_inv[None, :], H,
                  precision=lax.Precision.HIGHEST)

    assert out.shape == (N, out_size)
    err = float(jnp.max(jnp.abs(out - ref)))
    # Tolerance note: A is streamed exactly (0/1 in bf16) and all accumulation is
    # f32; the slack only covers possible bf16 operand rounding of the f32 MXU
    # matmul on older generations.
    assert jnp.allclose(out, ref, atol=5e-3, rtol=5e-3), f"mismatch vs reference: {err}"
    print("KERNEL_OK")
</pallas_src>

<mosaic_0001>
module attributes {stable_mosaic.version = 11 : i64} {
  func.func @_agg_kernel_resident(%arg0: i32, %arg1: i32, %arg2: memref<128x128xf32, #tpu.memory_space<vmem>>, %arg3: memref<64x128xbf16, #tpu.memory_space<vmem>>, %arg4: memref<64x128xf32, #tpu.memory_space<vmem>>, %arg5: memref<64x128xf32, #tpu.memory_space<vmem>>) attributes {dimension_semantics = [#tpu.dimension_semantics<parallel>, #tpu.dimension_semantics<arbitrary>], iteration_bounds = array<i64: 2, 1>, scalar_prefetch = 0 : i64, scratch_operands = 1 : i64, tpu.core_type = #tpu.core_type<tc>, window_params = [{pipeline_mode = #tpu.pipeline_mode<synchronous>, transform_indices = @transform_0, window_bounds = array<i64: 128, 128>}, {transform_indices = @transform_1, window_bounds = array<i64: 64, 128>}, {transform_indices = @transform_2, window_bounds = array<i64: 64, 128>}]} {
    %c0_i32 = arith.constant 0 : i32
    %0 = arith.cmpi eq, %arg1, %c0_i32 : i32
    %1 = arith.extui %0 : i1 to i32
    %c0_i32_0 = arith.constant 0 : i32
    %2 = arith.cmpi ne, %1, %c0_i32_0 : i32
    scf.if %2 {
      %cst_9 = arith.constant 0.000000e+00 : f32
      %15 = vector.broadcast %cst_9 : f32 to vector<64x128xf32>
      %c0_10 = arith.constant 0 : index
      %c0_11 = arith.constant 0 : index
      %16 = vector.load %arg5[%c0_10, %c0_11] : memref<64x128xf32, #tpu.memory_space<vmem>>, vector<64x128xf32>
      tpu.vector_store %arg5[%c0_10, %c0_11], %15 {strides = array<i32>} : memref<64x128xf32, #tpu.memory_space<vmem>>, vector<64x128xf32>,
    } else {
    }
    %c0 = arith.constant 0 : index
    %c0_1 = arith.constant 0 : index
    %3 = vector.load %arg3[%c0, %c0_1] : memref<64x128xbf16, #tpu.memory_space<vmem>>, vector<64x128xbf16>
    %4 = arith.extf %3 : vector<64x128xbf16> to vector<64x128xf32>
    %c0_2 = arith.constant 0 : index
    %c0_3 = arith.constant 0 : index
    %5 = vector.load %arg5[%c0_2, %c0_3] : memref<64x128xf32, #tpu.memory_space<vmem>>, vector<64x128xf32>
    %c128_i32 = arith.constant 128 : i32
    %6 = arith.muli %arg1, %c128_i32 : i32
    %7 = arith.index_cast %6 : i32 to index
    %c0_4 = arith.constant 0 : index
    %8 = vector.load %arg2[%7, %c0_4] : memref<128x128xf32, #tpu.memory_space<vmem>>, vector<128x128xf32>
    %cst = arith.constant dense<0.000000e+00> : vector<64x128xf32>
    %9 = tpu.matmul %4, %8, %cst {dimension_numbers = #tpu.dot_dimension_numbers<[1], [0], [0], [1], [0, 0, 1, 1], [], []>} : vector<64x128xf32>, vector<128x128xf32>, vector<64x128xf32> -> vector<64x128xf32>
    %10 = arith.addf %5, %9 : vector<64x128xf32>
    %c0_5 = arith.constant 0 : index
    %c0_6 = arith.constant 0 : index
    %11 = vector.load %arg5[%c0_5, %c0_6] : memref<64x128xf32, #tpu.memory_space<vmem>>, vector<64x128xf32>
    tpu.vector_store %arg5[%c0_5, %c0_6], %10 {strides = array<i32>} : memref<64x128xf32, #tpu.memory_space<vmem>>, vector<64x128xf32>,
    %c0_i32_7 = arith.constant 0 : i32
    %12 = arith.cmpi eq, %arg1, %c0_i32_7 : i32
    %13 = arith.extui %12 : i1 to i32
    %c0_i32_8 = arith.constant 0 : i32
    %14 = arith.cmpi ne, %13, %c0_i32_8 : i32
    scf.if %14 {
      %c0_9 = arith.constant 0 : index
      %c0_10 = arith.constant 0 : index
      %15 = vector.load %arg5[%c0_9, %c0_10] : memref<64x128xf32, #tpu.memory_space<vmem>>, vector<64x128xf32>
      %c0_11 = arith.constant 0 : index
      %c0_12 = arith.constant 0 : index
      %16 = vector.load %arg4[%c0_11, %c0_12] : memref<64x128xf32, #tpu.memory_space<vmem>>, vector<64x128xf32>
      tpu.vector_store %arg4[%c0_11, %c0_12], %15 {strides = array<i32>} : memref<64x128xf32, #tpu.memory_space<vmem>>, vector<64x128xf32>,
    } else {
    }
    return
  }
  func.func @transform_0(%arg0: i32, %arg1: i32) -> (i32, i32) {
    %c0_i32 = arith.constant 0 : i32
    %c0_i32_0 = arith.constant 0 : i32
    %c0_i32_1 = arith.constant 0 : i32
    return %c0_i32, %c0_i32_0 : i32, i32
  }
  func.func @transform_1(%arg0: i32, %arg1: i32) -> (i32, i32) {
    %c0_i32 = arith.constant 0 : i32
    return %arg0, %arg1 : i32, i32
  }
  func.func @transform_2(%arg0: i32, %arg1: i32) -> (i32, i32) {
    %c0_i32 = arith.constant 0 : i32
    %c0_i32_0 = arith.constant 0 : i32
    return %arg0, %c0_i32 : i32, i32
  }
}

</mosaic_0001>

<bundles_post_ra>
// kernel: tpu_custom_call.1
= control target key start
LH: loop header
LB: loop body
LE: loop exit
PB: predicated region body
PF: predicated region fallthrough
CT: control target
= control target key end

     0   :  { %7 = vsyncpa [#allocation4], 0  ;;  %s1128_s0 = inlined_call_operand.hbm [shape: f32[128,128], index: 0, kind: input, shape index: {}]   ;;  %s1129_s1 = inlined_call_operand.hbm [shape: bf16[128,128], index: 1, kind: input, shape index: {}]   ;;  %s1130_s2 = inlined_call_operand.hbm [shape: f32[128,128], index: 2, kind: output, shape index: {}]  }
   0x1   :  { %8 = vsyncpa [#allocation7], 0 }
   0x2   :  { %10 = vsyncpa [#allocation7 + $0x1], 0 }
   0x3   :  { %11 = vsyncpa [#allocation5], 0 }
   0x4   :  { %13 = vsyncpa [#allocation5 + $0x1], 0  ;;  %s902_s9 = smov 0   ;;  %s904_s10 = smov 0  }
   0x5   :  { %s906_s11 = smov 0   ;;  %s908_s12 = smov 0  }
   0x6   :  { %s910_s13 = smov 0   ;;  %s912_s14 = smov 0  }
   0x7 LB: > { %s499_s15 = sadd.s32 4294967295, %s876_s14   ;;  %s500_s16 = sadd.s32 4294967294, %s876_s14   ;;  %s876_s14 = sphi %s912_s14, %s19_s14   ;;  %s872_s13 = sphi %s910_s13, %s1154_s13   ;;  %s868_s12 = sphi %s908_s12, %s1153_s12   ;;  %s864_s11 = sphi %s906_s11, %s1152_s11   ;;  %s860_s10 = sphi %s904_s10, %s1151_s10   ;;  %s856_s9 = sphi %s902_s9, %s1150_s9  }
   0x8   : > { %p74_p0 = scmp.ne.s32.totalorder %s860_s10, %s856_s9  ;;  %p936_p1 = scmp.eq.s32.totalorder %s499_s15, 0 }
   0x9   : > { %p940_p2 = scmp.eq.s32.totalorder %s499_s15, 1  ;;  %p104_p3 = scmp.eq.s32.totalorder %s500_s16, 1 }
   0xa   : > { %s1135_s17 = scalar_select %p936_p1, 1, 0 }
   0xb   : > { %s1136_s18 = scalar_select %p940_p2, 1, 0 }
   0xc   : > { %p946_p4 = por %p936_p1, %p74_p0  ;;  %p501_p5 = scmp.ge.s32.totalorder %s876_s14, 1 }
   0xd   : > { %p951_p6 = por %p104_p3, %p74_p0  ;;  %p111_p7 = scmp.lt.s32.totalorder %s876_s14, 3 }
   0xe   : > { %s1137_s19 = scalar_select %p946_p4, 1, 0 }
   0xf   : > { %s1138_s20 = scalar_select %p951_p6, 1, 0 }
  0x10   : > { %p956_p8 = pnand %p501_p5, %p111_p7  ;;  %s878_s22 = smov [#allocation3]  }
  0x11   : > { %s123_s23 = sshll.u32 %s878_s22, 4  ;;  %s31_s25 = sadd.s32 1, %s872_s13  ;;  %s124_s23 = int_to_ptr.vmem [resolvable:$true] %s123_s23 }
  0x12   : > { %s1139_s21 = scalar_select %p956_p8, 1, 0 }
  0x13   : > { %p661_p9 = pneg %p956_p8  ;;  %s732_s28 = scalar_lea.hbm %s1128_s0, 2048 }
  0x14   : > { %p733_p12 = scmp.ne.s32.totalorder %s1128_s0, %s732_s28  ;;  %p739_p5 = scmp.lt.u32.totalorder %s732_s28, %s1128_s0 }
  0x15   : > { %p965_p11 = pnand %p661_p9, %p936_p1 }
  0x17   : > { %p734_p13 = pneg %p965_p11 }
  0x19   : > { %p735_p0 = pnand %p734_p13, %p733_p12 }
  0x1b   : > { %p736_p3 = pneg %p735_p0 }
  0x1d   : > { %p741_p7 = pnand %p739_p5, %p736_p3 }
  0x1f   : > { %744 = shalt.err (!%p741_p7)
}
  0x20   : > { %s745_s5 = scalar_lea.vmem %s124_s23, 2048  ;;  %p753_p4 = scmp.lt.s32.totalorder %s124_s23, %s124_s23 }
  0x21   : > { %p746_p9 = scmp.ne.s32.totalorder %s124_s23, %s745_s5  ;;  %p754_p1 = scmp.lt.s32.totalorder %s745_s5, %s745_s5 }
  0x23   : > { %p748_p10 = pnand %p746_p9, %p734_p13  ;;  %p755_p8 = por %p754_p1, %p753_p4 }
  0x25   : > { %p749_p6 = pneg %p748_p10 }
  0x27   : > { %p756_p2 = pnand %p755_p8, %p749_p6 }
  0x29   : > { %759 = shalt.err (!%p756_p2)
}
  0x2a   : > { %s879_s6 = smov 128   ;;  %s880_s7 = smov 8  }
  0x2b   : > { %664 = dma.hbm_to_vmem [thread:$0]  (!%p965_p11), %s1128_s0, 2048, %s124_s23, [#allocation4], %s879_s6, %s879_s6, %s880_s7  }
  0x2c   : > { %p33_p1 = scmp.ge.s32.totalorder %s31_s25, 2  ;;  %s61_s16 = sadd.s32 1, %s864_s11 }
  0x2d   : > { %p68_p2 = scmp.ne.s32.totalorder %s864_s11, %s860_s10  ;;  %p69_p4 = scmp.eq.s32.totalorder %s876_s14, 0 }
  0x2e   : > { %s1156_s25 = smov (%p33_p1, %s31_s25), 0  ;;  %p1142_p8 = scmp.ne.s32.totalorder %s1136_s18, 0 }
  0x2f   : > { %p992_p6 = por %p69_p4, %p68_p2  ;;  %s56_s24 = ssub.s32 %s872_s13, %s1156_s25 }
  0x30   : > { %p998_p10 = por %p1142_p8, %p68_p2  ;;  %p674_p12 = scmp.lt.s32.totalorder %s876_s14, 2 }
  0x31   : > { %p59_p11 = scmp.eq.s32.totalorder %s56_s24, 0  ;;  %s137_s23 = sand.u32 1, %s864_s11  }
  0x32   : > { %s504_s27 = sshll.u32 %s137_s23, 5  ;;  %s516_s29 = sshll.u32 %s872_s13, 9 }
  0x33   : > { %s1007_s28 = scalar_select %p59_p11, %s864_s11, %s61_s16  }
  0x34   : > { %s1013_s4 = scalar_lea.hbm %s1129_s1, %s516_s29  ;;  %s141_s18 = scalar_lea.vmem [#allocation6], %s504_s27 }
  0x35   : > { %s149_s5 = sshll.u32 %s141_s18, 4  ;;  %p1019_p13 = pnand %p674_p12, %p992_p6  ;;  %s1015_s5 = int_to_ptr.vmem [resolvable:$true] %s149_s5 }
  0x36   : > { %s1023_s7 = scalar_lea.sflag [#allocation7], %s137_s23  ;;  %s760_s8 = scalar_lea.hbm %s1013_s4, 512 }
  0x37   : > { %p761_p0 = scmp.ne.s32.totalorder %s1013_s4, %s760_s8  ;;  %p762_p3 = pneg %p1019_p13 }
  0x38   : > { %s765_s22 = scalar_lea.hbm %s1129_s1, 1024  ;;  %p766_p9 = scmp.lt.u32.totalorder %s1013_s4, %s1129_s1 }
  0x39   : > { %p763_p5 = pnand %p762_p3, %p761_p0  ;;  %p767_p1 = scmp.lt.u32.totalorder %s765_s22, %s760_s8 }
  0x3a   : > { %p769_p4 = scmp.lt.u32.totalorder %s760_s8, %s1013_s4 }
  0x3b   : > { %p764_p7 = pneg %p763_p5  ;;  %p768_p2 = por %p767_p1, %p766_p9 }
  0x3d   : > { %p770_p6 = por %p769_p4, %p768_p2 }
  0x3f   : > { %p771_p8 = pnand %p770_p6, %p764_p7 }
  0x41   : > { %774 = shalt.err (!%p771_p8)
}
  0x42   : > { %s775_s23 = scalar_lea.vmem %s1015_s5, 512  ;;  %s881_s29 = smov [#allocation6]  }
  0x43   : > { %p776_p12 = scmp.ne.s32.totalorder %s1015_s5, %s775_s23  ;;  %s780_s30 = sshll.u32 %s881_s29, 4  ;;  %s781_s30 = int_to_ptr.vmem [resolvable:$false] %s780_s30 }
  0x44   : > { %s782_s3 = scalar_lea.vmem %s781_s30, 1024  ;;  %p783_p5 = scmp.lt.s32.totalorder %s1015_s5, %s781_s30 }
  0x45   : > { %p778_p11 = pnand %p776_p12, %p762_p3  ;;  %p784_p9 = scmp.lt.s32.totalorder %s782_s3, %s775_s23 }
  0x47   : > { %p779_p0 = pneg %p778_p11  ;;  %p785_p1 = por %p784_p9, %p783_p5 }
  0x49   : > { %p786_p2 = pnand %p785_p1, %p779_p0 }
  0x4b   : > { %789 = shalt.err (!%p786_p2)
}
  0x4c   : > { %s882_s18 = smov 64   ;;  %s883_s8 = smov 4  }
  0x4d   : > { %668 = dma.hbm_to_vmem [thread:$0]  (!%p1019_p13), %s1013_s4, 512, %s1015_s5, %s1023_s7, %s882_s18, %s882_s18, %s883_s8  }
  0x4e   : > { %p1145_p3 = scmp.ne.s32.totalorder %s1139_s21, 0 }
  0x4f   : > { %p1146_p7 = scmp.ne.s32.totalorder (!%p1145_p3), %s1135_s17, 0 }
  0x50   : > { %161 = sbr.rel (%p1145_p3) target bundleno = 359 (0x167), region = 28 }
  0x57   : > { %843 = dma.done.wait (%p1146_p7), [#allocation4], 2048  }
  0x58   : > { %845 = vsyncadd (%p1146_p7), [#allocation4], 4294965248  ;;  %s1058_s15 = sand.u32 1, %s860_s10   ;;  %p1147_p13 = scmp.ne.s32.totalorder %s1137_s19, 0 }
  0x59   : > { %s509_s16 = sshll.u32 %s1058_s15, 5  ;;  %s168_s22 = scalar_lea.sflag [#allocation7], %s1058_s15 }
  0x5a   : > { %s1062_s24 = scalar_lea.vmem [#allocation6], %s509_s16 }
  0x5b   : > { %847 = dma.done.wait (%p1147_p13), %s168_s22, 512  }
  0x5c   : > { %849 = vsyncadd (%p1147_p13), %s168_s22, 4294966784  ;;  %v232_v0 = vld [vmem:[#allocation3] sm:$0xff]  ;;  %v233_v1 = vld [vmem:[#allocation3 + $0x8] sm:$0xff]  ;;  %s510_s17 = sshll.u32 %s1058_s15, 6  ;;  %s517_s4 = sshll.u32 %s868_s12, 10 }
  0x5d   : > { %v234_v2 = vld [vmem:[#allocation3 + $0x10] sm:$0xff]  ;;  %v605_v3 = vpack.c.bf16 %v233_v1, %v232_v0  ;;  %v235_v4 = vld [vmem:[#allocation3 + $0x18] sm:$0xff]  ;;  %v236_v6 = vld [vmem:[#allocation3 + $0x20] sm:$0xff]  ;;  %s191_s19 = scalar_lea.vmem [#allocation8], %s510_s17  ;;  %s1079_s7 = scalar_lea.hbm %s1130_s2, %s517_s4 }
  0x5e   : > { %v609_v5 = vpack.c.bf16 %v235_v4, %v234_v2  ;;  %v237_v7 = vld [vmem:[#allocation3 + $0x28] sm:$0xff]  ;;  %v519_v9 = vld [vmem:[%s1062_s24] sm:$0xff]   ;;  %v535_v10 = vld [vmem:[%s1062_s24 + $0x10] sm:$0xff]   ;;  %s402_s21 = sshll.u32 %s191_s19, 4  ;;  %s389_s12 = scalar_lea.sflag [#allocation5], %s1058_s15  ;;  %s1074_s21 = int_to_ptr.vmem [resolvable:$true] %s402_s21 }
  0x5f   : > { %606 = vmatprep.subr.bf16.mxu0 %v605_v3  ;;  %637 = vmatprep.subr.bf16.mxu1 %v605_v3  ;;  %v613_v8 = vpack.c.bf16 %v237_v7, %v236_v6  ;;  %v238_v11 = vld [vmem:[#allocation3 + $0x30] sm:$0xff]  ;;  %v239_v12 = vld [vmem:[#allocation3 + $0x38] sm:$0xff]  ;;  %v520_v13 = vunpack.c.l.bf16 %v519_v9  ;;  %v528_v14 = vunpack.c.l.bf16 %v535_v10  ;;  %v240_v16 = vld [vmem:[#allocation3 + $0x40] sm:$0xff]  ;;  %v521_v30 = vunpack.c.h.bf16 %v519_v9  ;;  %s790_s27 = scalar_lea.vmem %s1074_s21, 1024  ;;  %s884_s23 = smov [#allocation8]  }
  0x60   : > { %608 = vmatpush3.bf16.msra.mxu0 %v605_v3  ;;  %645 = vmatpush3.bf16.msra.mxu1 %v605_v3  ;;  %v617_v15 = vpack.c.bf16 %v239_v12, %v238_v11  ;;  %v241_v17 = vld [vmem:[#allocation3 + $0x48] sm:$0xff]  ;;  %v242_v19 = vld [vmem:[#allocation3 + $0x50] sm:$0xff]  ;;  %v243_v20 = vld [vmem:[#allocation3 + $0x58] sm:$0xff]  ;;  %v529_v31 = vunpack.c.h.bf16 %v535_v10  ;;  %p791_p4 = scmp.ne.s32.totalorder %s1074_s21, %s790_s27  ;;  %s794_s29 = sshll.u32 %s884_s23, 4  ;;  %s795_s29 = int_to_ptr.vmem [resolvable:$false] %s794_s29 }
  0x61   : > { %610 = vmatprep.subr.bf16.mxu0 %v609_v5  ;;  %638 = vmatprep.subr.bf16.mxu1 %v609_v5  ;;  %v621_v18 = vpack.c.bf16 %v241_v17, %v240_v16  ;;  %v625_v21 = vpack.c.bf16 %v243_v20, %v242_v19  ;;  %v244_v22 = vld [vmem:[#allocation3 + $0x60] sm:$0xff]  ;;  %v245_v23 = vld [vmem:[#allocation3 + $0x68] sm:$0xff]  ;;  %v246_v25 = vld [vmem:[#allocation3 + $0x70] sm:$0xff]  ;;  %s796_s30 = scalar_lea.vmem %s795_s29, 2048  ;;  %p797_p12 = scmp.lt.s32.totalorder %s1074_s21, %s795_s29 }
  0x62   : > { %593 = vmatprep.mubr.f32.mxu0 %v520_v13  ;;  %599 = vmatprep.mubr.f32.mxu1 %v528_v14  ;;  %v629_v24 = vpack.c.bf16 %v245_v23, %v244_v22  ;;  %v247_v26 = vld [vmem:[#allocation3 + $0x78] sm:$0xff]  ;;  %v534_v28 = vld [vmem:[%s1062_s24 + $0x8] sm:$0xff]   ;;  %p792_p6 = pnand %p791_p4, %p998_p10  ;;  %p798_p11 = scmp.lt.s32.totalorder %s796_s30, %s790_s27 }
  0x63   : > { %v633_v27 = vpack.c.bf16 %v247_v26, %v246_v25  ;;  %v536_v29 = vld [vmem:[%s1062_s24 + $0x18] sm:$0xff]   ;;  %v524_v32 = vunpack.c.l.bf16 %v534_v28  ;;  %v525_v34 = vunpack.c.h.bf16 %v534_v28 }
  0x64   : > { %612 = vmatpush3.bf16.msra.mxu0 %v609_v5  ;;  %646 = vmatpush3.bf16.msra.mxu1 %v609_v5  ;;  %v532_v33 = vunpack.c.l.bf16 %v536_v29  ;;  %v533_v35 = vunpack.c.h.bf16 %v536_v29  ;;  %p793_p8 = pneg %p792_p6  ;;  %p799_p0 = por %p798_p11, %p797_p12 }
  0x65   : > { %614 = vmatprep.subr.bf16.mxu0 %v613_v8  ;;  %639 = vmatprep.subr.bf16.mxu1 %v613_v8 }
  0x66   : > { %p800_p5 = pnand %p799_p0, %p793_p8 }
  0x68   : > { %616 = vmatpush3.bf16.msra.mxu0 %v613_v8  ;;  %647 = vmatpush3.bf16.msra.mxu1 %v613_v8 }
  0x69   : > { %618 = vmatprep.subr.bf16.mxu0 %v617_v15  ;;  %640 = vmatprep.subr.bf16.mxu1 %v617_v15 }
  0x6c   : > { %620 = vmatpush3.bf16.msra.mxu0 %v617_v15  ;;  %648 = vmatpush3.bf16.msra.mxu1 %v617_v15 }
  0x6d   : > { %622 = vmatprep.subr.bf16.mxu0 %v621_v18  ;;  %641 = vmatprep.subr.bf16.mxu1 %v621_v18 }
  0x70   : > { %624 = vmatpush3.bf16.msra.mxu0 %v621_v18  ;;  %649 = vmatpush3.bf16.msra.mxu1 %v621_v18 }
  0x71   : > { %626 = vmatprep.subr.bf16.mxu0 %v625_v21  ;;  %642 = vmatprep.subr.bf16.mxu1 %v625_v21 }
  0x74   : > { %628 = vmatpush3.bf16.msra.mxu0 %v625_v21  ;;  %650 = vmatpush3.bf16.msra.mxu1 %v625_v21 }
  0x75   : > { %630 = vmatprep.subr.bf16.mxu0 %v629_v24  ;;  %643 = vmatprep.subr.bf16.mxu1 %v629_v24 }
  0x78   : > { %632 = vmatpush3.bf16.msra.mxu0 %v629_v24  ;;  %651 = vmatpush3.bf16.msra.mxu1 %v629_v24 }
  0x79   : > { %634 = vmatprep.subr.bf16.mxu0 %v633_v27  ;;  %644 = vmatprep.subr.bf16.mxu1 %v633_v27 }
  0x7c   : > { %636 = vmatpush3.bf16.msra.mxu0 %v633_v27  ;;  %652 = vmatpush3.bf16.msra.mxu1 %v633_v27 }
  0x7f   : > { %594 = vmatmul.mubr.f32.vlgmr.msra.gmra.mrb[0].mxu0 %v521_v30  ;;  %600 = vmatmul.mubr.f32.vlgmr.msra.gmra.mrb[0].mxu1 %v529_v31 }
  0x80   : > { %596 = vmatprep.mubr.f32.mxu0 %v524_v32  ;;  %602 = vmatprep.mubr.f32.mxu1 %v532_v33 }
  0x83   : > { %597 = vmatmul.mubr.f32.gmra.mrb[2].mxu0 %v525_v34  ;;  %603 = vmatmul.mubr.f32.gmra.mrb[2].mxu1 %v533_v35 }
 0x152   : > { %v595_v36 = vpop.f32.mrb[0].mxu0  ;;  %v601_v37 = vpop.f32.mrb[0].mxu1 }
 0x153   : > { %381 = vst [vmem:[%s191_s19 + $0x8] sm:$0xff] %v595_v36  ;;  %385 = vst [vmem:[%s191_s19 + $0x28] sm:$0xff] %v601_v37  ;;  %v314_v38 = vpop.f32.mrb[1].mxu0  ;;  %v334_v39 = vpop.f32.mrb[1].mxu1 }
 0x154   : > { %380 = vst [vmem:[%s191_s19] sm:$0xff] %v314_v38  ;;  %384 = vst [vmem:[%s191_s19 + $0x20] sm:$0xff] %v334_v39 }
 0x156   : > { %v598_v40 = vpop.f32.mrb[2].mxu0  ;;  %v604_v41 = vpop.f32.mrb[2].mxu1 }
 0x157   : > { %383 = vst [vmem:[%s191_s19 + $0x18] sm:$0xff] %v598_v40  ;;  %387 = vst [vmem:[%s191_s19 + $0x38] sm:$0xff] %v604_v41  ;;  %v324_v42 = vpop.f32.mrb[3].mxu0  ;;  %v344_v43 = vpop.f32.mrb[3].mxu1 }
 0x158   : > { %382 = vst [vmem:[%s191_s19 + $0x10] sm:$0xff] %v324_v42  ;;  %386 = vst [vmem:[%s191_s19 + $0x30] sm:$0xff] %v344_v43 }
 0x159   : > { %803 = shalt.err (!%p800_p5)
}
 0x15a   : > { %s804_s3 = scalar_lea.hbm %s1079_s7, 1024  ;;  %s808_s16 = scalar_lea.hbm %s1130_s2, 2048 }
 0x15b   : > { %p805_p9 = scmp.ne.s32.totalorder %s1079_s7, %s804_s3  ;;  %p809_p3 = scmp.lt.u32.totalorder %s1079_s7, %s1130_s2 }
 0x15c   : > { %p810_p7 = scmp.lt.u32.totalorder %s808_s16, %s804_s3  ;;  %p812_p4 = scmp.lt.u32.totalorder %s804_s3, %s1079_s7 }
 0x15d   : > { %p806_p1 = pnand %p805_p9, %p998_p10 }
 0x15e   : > { %p811_p13 = por %p810_p7, %p809_p3 }
 0x15f   : > { %p807_p2 = pneg %p806_p1 }
 0x160   : > { %p813_p6 = por %p812_p4, %p811_p13 }
 0x162   : > { %p814_p8 = pnand %p813_p6, %p807_p2 }
 0x164   : > { %817 = shalt.err (!%p814_p8)
}
 0x165   : > { %s885_s17 = smov 128   ;;  %s886_s19 = smov 8  }
 0x166   : > { %659 = dma.vmem_to_hbm [thread:$0]  (%p998_p10), %s1074_s21, 1024, %s1079_s7, %s389_s12, %s885_s17, %s885_s17, %s886_s19  }
 0x167 PF: > { %s417_s4 = sand.u32 1, %s856_s9   ;;  %p1148_p12 = scmp.ne.s32.totalorder %s1138_s20, 0 }
 0x168   : > { %p1149_p11 = scmp.ge.s32.totalorder %s876_s14, 2  ;;  %s418_s5 = scalar_lea.sflag [#allocation5], %s417_s4 }
 0x16a   : > { %p670_p0 = pnand %p1149_p11, %p1148_p12 }
 0x16c   : > { %851 = dma.done.wait (!%p670_p0), %s418_s5, 1024  }
 0x16d   : > { %853 = vsyncadd (!%p670_p0), %s418_s5, 4294966272  ;;  %s19_s14 = sadd.s32 1, %s876_s14   ;;  %s1150_s9 = smov %s860_s10 }
 0x16e   : > { %p16_p5 = scmp.ge.s32.totalorder %s19_s14, 4   ;;  %s1151_s10 = smov %s864_s11 }
 0x16f   : > { %s1152_s11 = smov %s1007_s28  ;;  %s1153_s12 = smov %s872_s13 }
 0x170   : > { %s1154_s13 = smov %s1156_s25  ;;  %18 = sbr.rel (!%p16_p5) target bundleno = 7 (0x7), region = 87 }
 0x177   :  { %423 = vsyncpa [#allocation4], 1 }
 0x178   :  { %425 = vsyncpa [#allocation4 + $0x1], 1 }
 0x179   :  { %426 = vsyncpa [#allocation7], 1 }
 0x17a   :  { %428 = vsyncpa [#allocation7 + $0x1], 1 }
 0x17b   :  { %429 = vsyncpa [#allocation5], 1 }
 0x17c   :  { %431 = vsyncpa [#allocation5 + $0x1], 1 }

</bundles_post_ra>
